<compile_context>
chip_gen: v7x
topology: tpu7x:2x2x1
jax: 0.10.0
libtpu: 0.0.40
codegen_flags: <defaults>
</compile_context>

<pallas_src>
import numpy as np
import jax
import jax.numpy as jnp
from jax.experimental import pallas as pl
from jax.experimental.pallas import tpu as pltpu

NUM_CLASSES = 7
FEATURE_DIM = 512      # resnet18 backbone: fc.in_features == 512
HIDDEN1 = 512
HIDDEN2 = 256
OUT_PAD = 8            # classes padded to one f32 sublane group (>= NUM_CLASSES)
MAX_TB = 512           # max batch rows per grid step (~85% HBM roofline at 512)


def _round_up(x, m):
    return ((x + m - 1) // m) * m


def _head_kernel(x_ref, w1_ref, b1_ref, w2_ref, b2_ref, w3_ref, b3_ref,
                 out_ref):
    # x_ref: (TB, FEATURE_DIM) bf16 pooled features; weights bf16, biases f32.
    x = x_ref[...]

    h1 = jnp.dot(x, w1_ref[...], preferred_element_type=jnp.float32)
    h1 = jnp.maximum(h1 + b1_ref[...], 0.0)                       # (TB, 512) f32

    h2 = jnp.dot(h1.astype(jnp.bfloat16), w2_ref[...],
                 preferred_element_type=jnp.float32)
    h2 = jnp.maximum(h2 + b2_ref[...], 0.0)                       # (TB, 256) f32

    logits = jnp.dot(h2.astype(jnp.bfloat16), w3_ref[...],
                     preferred_element_type=jnp.float32)
    out_ref[...] = logits + b3_ref[...]                           # (TB, 8) f32


def defect_classifier_head(features_nchw, params):
    """features_nchw: (B, C=FEATURE_DIM, Hf, Wf) float32 backbone feature map."""
    B, C, Hf, Wf = features_nchw.shape
    assert C == FEATURE_DIM

    # adaptive_avg_pool2d((1,1)) + flatten in the wrapper (fused by XLA).
    # Cast to bf16 before padding so the pad copy moves half the bytes.
    pooled = jnp.mean(features_nchw, axis=(2, 3)).astype(jnp.bfloat16)  # (B, C)

    # Batch tiling: multiples of 16 (bf16 sublane packing); aim for >= 2 grid
    # steps when the batch allows so v7x can use both TensorCores; cap at MAX_TB.
    B16 = _round_up(B, 16)
    TB = min(MAX_TB, _round_up((B16 + 1) // 2, 16))
    B_pad = _round_up(B16, TB)
    pooled = jnp.pad(pooled, ((0, B_pad - B), (0, 0)))

    # bf16 weights (halves the resident weight-DMA traffic), f32 biases.
    w1 = params["w1"].astype(jnp.bfloat16)
    w2 = params["w2"].astype(jnp.bfloat16)
    w3 = jnp.pad(params["w3"], ((0, 0), (0, OUT_PAD - NUM_CLASSES))
                 ).astype(jnp.bfloat16)                           # (256, 8)
    b1 = params["b1"]
    b2 = params["b2"]
    b3 = jnp.pad(params["b3"], ((0, 0), (0, OUT_PAD - NUM_CLASSES)))  # (1, 8)

    grid = (B_pad // TB,)
    const = lambda shape: pl.BlockSpec(shape, lambda i: (0,) * len(shape))

    flops = 2 * B_pad * (FEATURE_DIM * HIDDEN1 + HIDDEN1 * HIDDEN2
                         + HIDDEN2 * OUT_PAD)
    bytes_accessed = (pooled.size * 2
                      + w1.size * 2 + w2.size * 2 + w3.size * 2
                      + (b1.size + b2.size + b3.size) * 4
                      + B_pad * OUT_PAD * 4)

    out_padded = pl.pallas_call(
        _head_kernel,
        out_shape=jax.ShapeDtypeStruct((B_pad, OUT_PAD), jnp.float32),
        grid=grid,
        in_specs=[
            pl.BlockSpec((TB, FEATURE_DIM), lambda i: (i, 0)),    # feature tile
            const((FEATURE_DIM, HIDDEN1)), const((1, HIDDEN1)),   # resident
            const((HIDDEN1, HIDDEN2)),     const((1, HIDDEN2)),   # resident
            const((HIDDEN2, OUT_PAD)),     const((1, OUT_PAD)),   # resident
        ],
        out_specs=pl.BlockSpec((TB, OUT_PAD), lambda i: (i, 0)),
        compiler_params=pltpu.CompilerParams(
            dimension_semantics=("parallel",)),
        cost_estimate=pl.CostEstimate(flops=flops, transcendentals=0,
                                      bytes_accessed=bytes_accessed),
    )(pooled, w1, b1, w2, b2, w3, b3)

    return out_padded[:B, :NUM_CLASSES]


def init_params(key):
    """Deterministic nn.Linear-style init: U(-1/sqrt(fan_in), 1/sqrt(fan_in))."""
    def linear(k, fan_in, fan_out):
        kw, kb = jax.random.split(k)
        bound = 1.0 / np.sqrt(fan_in)
        w = jax.random.uniform(kw, (fan_in, fan_out), jnp.float32, -bound, bound)
        b = jax.random.uniform(kb, (1, fan_out), jnp.float32, -bound, bound)
        return w, b

    k1, k2, k3 = jax.random.split(key, 3)
    w1, b1 = linear(k1, FEATURE_DIM, HIDDEN1)
    w2, b2 = linear(k2, HIDDEN1, HIDDEN2)
    w3, b3 = linear(k3, HIDDEN2, NUM_CLASSES)
    return dict(w1=w1, b1=b1, w2=w2, b2=b2, w3=w3, b3=b3)


def reference_head(features_nchw, params):
    """Full-precision reference of the classification head (eval mode)."""
    pooled = jnp.mean(features_nchw, axis=(2, 3))                 # (B, C)
    h1 = jnp.maximum(pooled @ params["w1"] + params["b1"], 0.0)
    h2 = jnp.maximum(h1 @ params["w2"] + params["b2"], 0.0)
    return h2 @ params["w3"] + params["b3"]


if __name__ == "__main__":
    key = jax.random.PRNGKey(0)
    k_feat, k_param = jax.random.split(key)

    # small shapes: batch=2, backbone feature map (B, 512, 4, 4)
    features = jax.random.normal(k_feat, (2, FEATURE_DIM, 4, 4), jnp.float32)
    params = init_params(k_param)

    logits = defect_classifier_head(features, params)
    logits = jax.block_until_ready(logits)
    assert logits.shape == (2, NUM_CLASSES)

    ref = reference_head(features, params)
    # bf16 matmul inputs -> loosened tolerance vs. f32 reference.
    np.testing.assert_allclose(np.asarray(logits), np.asarray(ref),
                               rtol=2e-2, atol=2e-2)
    print("KERNEL_OK")
</pallas_src>

<mosaic_0001>
module attributes {stable_mosaic.version = 11 : i64} {
  func.func @_head_kernel(%arg0: i32, %arg1: memref<16x512xbf16, #tpu.memory_space<vmem>>, %arg2: memref<512x512xbf16, #tpu.memory_space<vmem>>, %arg3: memref<1x512xf32, #tpu.memory_space<vmem>>, %arg4: memref<512x256xbf16, #tpu.memory_space<vmem>>, %arg5: memref<1x256xf32, #tpu.memory_space<vmem>>, %arg6: memref<256x8xbf16, #tpu.memory_space<vmem>>, %arg7: memref<1x8xf32, #tpu.memory_space<vmem>>, %arg8: memref<16x8xf32, #tpu.memory_space<vmem>>) attributes {dimension_semantics = [#tpu.dimension_semantics<parallel>], iteration_bounds = array<i64: 1>, scalar_prefetch = 0 : i64, scratch_operands = 0 : i64, tpu.core_type = #tpu.core_type<tc>, window_params = [{transform_indices = @transform_0, window_bounds = array<i64: 16, 512>}, {pipeline_mode = #tpu.pipeline_mode<synchronous>, transform_indices = @transform_1, window_bounds = array<i64: 512, 512>}, {pipeline_mode = #tpu.pipeline_mode<synchronous>, transform_indices = @transform_2, window_bounds = array<i64: 1, 512>}, {pipeline_mode = #tpu.pipeline_mode<synchronous>, transform_indices = @transform_3, window_bounds = array<i64: 512, 256>}, {pipeline_mode = #tpu.pipeline_mode<synchronous>, transform_indices = @transform_4, window_bounds = array<i64: 1, 256>}, {pipeline_mode = #tpu.pipeline_mode<synchronous>, transform_indices = @transform_5, window_bounds = array<i64: 256, 8>}, {pipeline_mode = #tpu.pipeline_mode<synchronous>, transform_indices = @transform_6, window_bounds = array<i64: 1, 8>}, {transform_indices = @transform_7, window_bounds = array<i64: 16, 8>}]} {
    %c0 = arith.constant 0 : index
    %c0_0 = arith.constant 0 : index
    %0 = vector.load %arg1[%c0, %c0_0] : memref<16x512xbf16, #tpu.memory_space<vmem>>, vector<16x512xbf16>
    %c0_1 = arith.constant 0 : index
    %c0_2 = arith.constant 0 : index
    %1 = vector.load %arg2[%c0_1, %c0_2] : memref<512x512xbf16, #tpu.memory_space<vmem>>, vector<512x512xbf16>
    %cst = arith.constant dense<0.000000e+00> : vector<16x512xf32>
    %2 = tpu.matmul %0, %1, %cst {dimension_numbers = #tpu.dot_dimension_numbers<[1], [0], [0], [1], [0, 0, 1, 1], [], []>} : vector<16x512xbf16>, vector<512x512xbf16>, vector<16x512xf32> -> vector<16x512xf32>
    %c0_3 = arith.constant 0 : index
    %c0_4 = arith.constant 0 : index
    %3 = vector.load %arg3[%c0_3, %c0_4] : memref<1x512xf32, #tpu.memory_space<vmem>>, vector<1x512xf32>
    %4 = vector.broadcast %3 : vector<1x512xf32> to vector<16x512xf32>
    %5 = arith.addf %2, %4 : vector<16x512xf32>
    %cst_5 = arith.constant 0.000000e+00 : f32
    %6 = vector.broadcast %cst_5 : f32 to vector<16x512xf32>
    %7 = arith.maximumf %5, %6 : vector<16x512xf32>
    %8 = arith.truncf %7 : vector<16x512xf32> to vector<16x512xbf16>
    %c0_6 = arith.constant 0 : index
    %c0_7 = arith.constant 0 : index
    %9 = vector.load %arg4[%c0_6, %c0_7] : memref<512x256xbf16, #tpu.memory_space<vmem>>, vector<512x256xbf16>
    %cst_8 = arith.constant dense<0.000000e+00> : vector<16x256xf32>
    %10 = tpu.matmul %8, %9, %cst_8 {dimension_numbers = #tpu.dot_dimension_numbers<[1], [0], [0], [1], [0, 0, 1, 1], [], []>} : vector<16x512xbf16>, vector<512x256xbf16>, vector<16x256xf32> -> vector<16x256xf32>
    %c0_9 = arith.constant 0 : index
    %c0_10 = arith.constant 0 : index
    %11 = vector.load %arg5[%c0_9, %c0_10] : memref<1x256xf32, #tpu.memory_space<vmem>>, vector<1x256xf32>
    %12 = vector.broadcast %11 : vector<1x256xf32> to vector<16x256xf32>
    %13 = arith.addf %10, %12 : vector<16x256xf32>
    %cst_11 = arith.constant 0.000000e+00 : f32
    %14 = vector.broadcast %cst_11 : f32 to vector<16x256xf32>
    %15 = arith.maximumf %13, %14 : vector<16x256xf32>
    %16 = arith.truncf %15 : vector<16x256xf32> to vector<16x256xbf16>
    %c0_12 = arith.constant 0 : index
    %c0_13 = arith.constant 0 : index
    %17 = vector.load %arg6[%c0_12, %c0_13] : memref<256x8xbf16, #tpu.memory_space<vmem>>, vector<256x8xbf16>
    %cst_14 = arith.constant dense<0.000000e+00> : vector<16x8xf32>
    %18 = tpu.matmul %16, %17, %cst_14 {dimension_numbers = #tpu.dot_dimension_numbers<[1], [0], [0], [1], [0, 0, 1, 1], [], []>} : vector<16x256xbf16>, vector<256x8xbf16>, vector<16x8xf32> -> vector<16x8xf32>
    %c0_15 = arith.constant 0 : index
    %c0_16 = arith.constant 0 : index
    %19 = vector.load %arg7[%c0_15, %c0_16] : memref<1x8xf32, #tpu.memory_space<vmem>>, vector<1x8xf32>
    %20 = vector.broadcast %19 : vector<1x8xf32> to vector<16x8xf32>
    %21 = arith.addf %18, %20 : vector<16x8xf32>
    %c0_17 = arith.constant 0 : index
    %c0_18 = arith.constant 0 : index
    %22 = vector.load %arg8[%c0_17, %c0_18] : memref<16x8xf32, #tpu.memory_space<vmem>>, vector<16x8xf32>
    tpu.vector_store %arg8[%c0_17, %c0_18], %21 {strides = array<i32>} : memref<16x8xf32, #tpu.memory_space<vmem>>, vector<16x8xf32>,
    return
  }
  func.func @transform_0(%arg0: i32) -> (i32, i32) {
    %c0_i32 = arith.constant 0 : i32
    %c0_i32_0 = arith.constant 0 : i32
    return %arg0, %c0_i32 : i32, i32
  }
  func.func @transform_1(%arg0: i32) -> (i32, i32) {
    %c0_i32 = arith.constant 0 : i32
    %c0_i32_0 = arith.constant 0 : i32
    %c0_i32_1 = arith.constant 0 : i32
    return %c0_i32, %c0_i32_0 : i32, i32
  }
  func.func @transform_2(%arg0: i32) -> (i32, i32) {
    %c0_i32 = arith.constant 0 : i32
    %c0_i32_0 = arith.constant 0 : i32
    %c0_i32_1 = arith.constant 0 : i32
    return %c0_i32, %c0_i32_0 : i32, i32
  }
  func.func @transform_3(%arg0: i32) -> (i32, i32) {
    %c0_i32 = arith.constant 0 : i32
    %c0_i32_0 = arith.constant 0 : i32
    %c0_i32_1 = arith.constant 0 : i32
    return %c0_i32, %c0_i32_0 : i32, i32
  }
  func.func @transform_4(%arg0: i32) -> (i32, i32) {
    %c0_i32 = arith.constant 0 : i32
    %c0_i32_0 = arith.constant 0 : i32
    %c0_i32_1 = arith.constant 0 : i32
    return %c0_i32, %c0_i32_0 : i32, i32
  }
  func.func @transform_5(%arg0: i32) -> (i32, i32) {
    %c0_i32 = arith.constant 0 : i32
    %c0_i32_0 = arith.constant 0 : i32
    %c0_i32_1 = arith.constant 0 : i32
    return %c0_i32, %c0_i32_0 : i32, i32
  }
  func.func @transform_6(%arg0: i32) -> (i32, i32) {
    %c0_i32 = arith.constant 0 : i32
    %c0_i32_0 = arith.constant 0 : i32
    %c0_i32_1 = arith.constant 0 : i32
    return %c0_i32, %c0_i32_0 : i32, i32
  }
  func.func @transform_7(%arg0: i32) -> (i32, i32) {
    %c0_i32 = arith.constant 0 : i32
    %c0_i32_0 = arith.constant 0 : i32
    return %arg0, %c0_i32 : i32, i32
  }
}

</mosaic_0001>

<bundles_post_ra>
// kernel: tpu_custom_call.1
= control target key start
LH: loop header
LB: loop body
LE: loop exit
PB: predicated region body
PF: predicated region fallthrough
CT: control target
= control target key end

     0   :  { %12 = vsyncpa [#allocation3], 0  ;;  %s2526_s0 = inlined_call_operand.vmem [shape: bf16[16,512], index: 0, kind: input, shape index: {}]   ;;  %s2527_s1 = inlined_call_operand.hbm [shape: bf16[512,512], index: 1, kind: input, shape index: {}]   ;;  %s2528_s2 = inlined_call_operand.vmem [shape: f32[1,512], index: 2, kind: input, shape index: {}]   ;;  %s2529_s3 = inlined_call_operand.hbm [shape: bf16[512,256], index: 3, kind: input, shape index: {}]   ;;  %s2530_s4 = inlined_call_operand.vmem [shape: f32[1,256], index: 4, kind: input, shape index: {}]   ;;  %s2531_s5 = inlined_call_operand.vmem [shape: bf16[256,8], index: 5, kind: input, shape index: {}]   ;;  %s2532_s6 = inlined_call_operand.vmem [shape: f32[1,8], index: 6, kind: input, shape index: {}]   ;;  %s2533_s7 = inlined_call_operand.vmem [shape: f32[16,8], index: 7, kind: output, shape index: {}]  }
   0x1   :  { %13 = vsyncpa [#allocation5], 0  ;;  %s2349_s24 = smov [#allocation2]   ;;  %s2301_s28 = scalar_lea.hbm %s2527_s1, 16384 }
   0x2   :  { %s21_s25 = sshll.u32 %s2349_s24, 4  ;;  %p2302_p0 = scmp.ne.s32.totalorder %s2527_s1, %s2301_s28  ;;  %s22_s25 = int_to_ptr.vmem [resolvable:$true] %s21_s25 }
   0x3   :  { %p2305_p1 = scmp.lt.u32.totalorder %s2301_s28, %s2527_s1 }
   0x5   :  { %p2307_p2 = pnand %p2305_p1, %p2302_p0 }
   0x7   :  { %2310 = shalt.err (!%p2307_p2)
}
   0x8   :  { %s2311_s10 = scalar_lea.vmem %s22_s25, 16384  ;;  %p2316_p4 = scmp.lt.s32.totalorder %s22_s25, %s22_s25 }
   0x9   :  { %p2312_p3 = scmp.ne.s32.totalorder %s22_s25, %s2311_s10  ;;  %p2317_p5 = scmp.lt.s32.totalorder %s2311_s10, %s2311_s10 }
   0xb   :  { %p2318_p6 = por %p2317_p5, %p2316_p4 }
   0xd   :  { %p2319_p7 = pnand %p2318_p6, %p2312_p3 }
   0xf   :  { %2322 = shalt.err (!%p2319_p7)
}
  0x10   :  { %s2350_s11 = smov 256   ;;  %s2351_s12 = smov 16  }
  0x11   :  { %27 = dma.hbm_to_vmem [thread:$0]  %s2527_s1, 16384, %s22_s25, [#allocation3], %s2350_s11, %s2350_s11, %s2351_s12  }
  0x12   :  { %s2352_s15 = smov [#allocation4]   ;;  %s2323_s19 = scalar_lea.hbm %s2529_s3, 8192 }
  0x13   :  { %s35_s16 = sshll.u32 %s2352_s15, 4  ;;  %p2324_p8 = scmp.ne.s32.totalorder %s2529_s3, %s2323_s19  ;;  %s36_s16 = int_to_ptr.vmem [resolvable:$true] %s35_s16 }
  0x14   :  { %p2327_p9 = scmp.lt.u32.totalorder %s2323_s19, %s2529_s3 }
  0x16   :  { %p2329_p10 = pnand %p2327_p9, %p2324_p8 }
  0x18   :  { %2332 = shalt.err (!%p2329_p10)
}
  0x19   :  { %s2333_s24 = scalar_lea.vmem %s36_s16, 8192  ;;  %p2338_p12 = scmp.lt.s32.totalorder %s36_s16, %s36_s16 }
  0x1a   :  { %p2334_p11 = scmp.ne.s32.totalorder %s36_s16, %s2333_s24  ;;  %p2339_p13 = scmp.lt.s32.totalorder %s2333_s24, %s2333_s24 }
  0x1c   :  { %p2340_p0 = por %p2339_p13, %p2338_p12 }
  0x1e   :  { %p2341_p1 = pnand %p2340_p0, %p2334_p11 }
  0x20   :  { %2344 = shalt.err (!%p2341_p1)
}
  0x21   :  { %s2353_s1 = smov 128   ;;  %s2354_s25 = smov 8  }
  0x22   :  { %41 = dma.hbm_to_vmem [thread:$0]  %s2529_s3, 8192, %s36_s16, [#allocation5], %s2353_s1, %s2353_s1, %s2354_s25  }
  0x23   :  { %2345 = dma.done.wait [#allocation3], 16384  }
  0x24   :  { %2346 = vsyncadd [#allocation3], 4294950912 }
  0x25   :  { %2347 = dma.done.wait [#allocation5], 8192  }
  0x26   :  { %2348 = vsyncadd [#allocation5], 4294959104  ;;  %v1991_v0 = vld [vmem:[#allocation2 + $0x4] ss:$16 sps:$4 sm:$0xff]   ;;  %v1993_v1 = vld [vmem:[#allocation2] ss:$16 sps:$4 sm:$0xff]  }
  0x27   :  { %869 = vmatprep.subr.bf16.mxu1 %v1991_v0  ;;  %v1994_v2 = vld [vmem:[#allocation2 + $0x204] ss:$16 sps:$4 sm:$0xff]   ;;  %v1996_v3 = vld [vmem:[#allocation2 + $0x200] ss:$16 sps:$4 sm:$0xff]   ;;  %v2425_v51 = vld [vmem:[%s2526_s0 + $0xc] ss:$16 sps:$4 sm:$0xff]  }
  0x28   :  { %870 = vmatpush1.bf16.msra.mxu1 %v1993_v1  ;;  %v1997_v4 = vld [vmem:[#allocation2 + $0x24] ss:$16 sps:$4 sm:$0xff]   ;;  %v1999_v5 = vld [vmem:[#allocation2 + $0x20] ss:$16 sps:$4 sm:$0xff]   ;;  %912 = vmatprep.subr.bf16.mxu0 %v1994_v2  ;;  %v2092_v1 = vld [vmem:[#allocation2 + $0xc] ss:$16 sps:$4 sm:$0xff]  }
  0x29   :  { %v2000_v6 = vld [vmem:[#allocation2 + $0x224] ss:$16 sps:$4 sm:$0xff]   ;;  %913 = vmatpush1.bf16.msra.mxu0 %v1996_v3  ;;  %871 = vmatprep.subr.bf16.mxu1 %v1997_v4  ;;  %v2002_v7 = vld [vmem:[#allocation2 + $0x220] ss:$16 sps:$4 sm:$0xff]   ;;  %v2090_v4 = vld [vmem:[#allocation2 + $0x8] ss:$16 sps:$4 sm:$0xff]  }
  0x2a   :  { %914 = vmatprep.subr.bf16.mxu0 %v2000_v6  ;;  %v2003_v8 = vld [vmem:[#allocation2 + $0x44] ss:$16 sps:$4 sm:$0xff]   ;;  %v2005_v9 = vld [vmem:[#allocation2 + $0x40] ss:$16 sps:$4 sm:$0xff]   ;;  %944 = vmatprep.mubr.bf16.mxu0 %v2425_v51  ;;  %v2098_v6 = vld [vmem:[#allocation2 + $0x2c] ss:$16 sps:$4 sm:$0xff]  }
  0x2b   :  { %v2006_v10 = vld [vmem:[#allocation2 + $0x244] ss:$16 sps:$4 sm:$0xff]   ;;  %v2008_v12 = vld [vmem:[#allocation2 + $0x240] ss:$16 sps:$4 sm:$0xff]   ;;  %vm1717_vm0 = vcmask 64512  }
  0x2c   :  { %872 = vmatpush1.bf16.msra.mxu1 %v1999_v5  ;;  %v2009_v11 = vld [vmem:[#allocation2 + $0x64] ss:$16 sps:$4 sm:$0xff]   ;;  %v2011_v14 = vld [vmem:[#allocation2 + $0x60] ss:$16 sps:$4 sm:$0xff]   ;;  %v2436_v5 = vld [vmem:[%s2526_s0 + $0x8] ss:$16 sps:$4 sm:$0xff]  }
  0x2d   :  { %873 = vmatprep.subr.bf16.mxu1 %v2003_v8  ;;  %915 = vmatpush1.bf16.msra.mxu0 %v2002_v7  ;;  %v2012_v13 = vld [vmem:[#allocation2 + $0x264] ss:$16 sps:$4 sm:$0xff]   ;;  %v2014_v16 = vld [vmem:[#allocation2 + $0x260] ss:$16 sps:$4 sm:$0xff]   ;;  %v2096_v7 = vld [vmem:[#allocation2 + $0x28] ss:$16 sps:$4 sm:$0xff]  }
  0x2e   :  { %916 = vmatprep.subr.bf16.mxu0 %v2006_v10  ;;  %v2015_v15 = vld [vmem:[#allocation2 + $0x84] ss:$16 sps:$4 sm:$0xff]   ;;  %v2017_v18 = vld [vmem:[#allocation2 + $0x80] ss:$16 sps:$4 sm:$0xff]   ;;  %v2101_v8 = vld [vmem:[#allocation2 + $0x4c] ss:$16 sps:$4 sm:$0xff]  }
  0x2f   :  { %v2018_v17 = vld [vmem:[#allocation2 + $0x284] ss:$16 sps:$4 sm:$0xff]   ;;  %v2020_v20 = vld [vmem:[#allocation2 + $0x280] ss:$16 sps:$4 sm:$0xff]   ;;  %v2104_v10 = vld [vmem:[#allocation2 + $0x6c] ss:$16 sps:$4 sm:$0xff]  }
  0x30   :  { %874 = vmatpush1.bf16.msra.mxu1 %v2005_v9  ;;  %v2021_v19 = vld [vmem:[#allocation2 + $0xa4] ss:$16 sps:$4 sm:$0xff]   ;;  %v2023_v22 = vld [vmem:[#allocation2 + $0xa0] ss:$16 sps:$4 sm:$0xff]   ;;  %v2099_v9 = vld [vmem:[#allocation2 + $0x48] ss:$16 sps:$4 sm:$0xff]  }
  0x31   :  { %875 = vmatprep.subr.bf16.mxu1 %v2009_v11  ;;  %917 = vmatpush1.bf16.msra.mxu0 %v2008_v12  ;;  %v2024_v21 = vld [vmem:[#allocation2 + $0x2a4] ss:$16 sps:$4 sm:$0xff]   ;;  %v2026_v24 = vld [vmem:[#allocation2 + $0x2a0] ss:$16 sps:$4 sm:$0xff]   ;;  %v2102_v11 = vld [vmem:[#allocation2 + $0x68] ss:$16 sps:$4 sm:$0xff]  }
  0x32   :  { %918 = vmatprep.subr.bf16.mxu0 %v2012_v13  ;;  %v2027_v23 = vld [vmem:[#allocation2 + $0xc4] ss:$16 sps:$4 sm:$0xff]   ;;  %v2029_v26 = vld [vmem:[#allocation2 + $0xc0] ss:$16 sps:$4 sm:$0xff]   ;;  %v2107_v12 = vld [vmem:[#allocation2 + $0x8c] ss:$16 sps:$4 sm:$0xff]  }
  0x33   :  { %v2030_v25 = vld [vmem:[#allocation2 + $0x2c4] ss:$16 sps:$4 sm:$0xff]   ;;  %v2032_v28 = vld [vmem:[#allocation2 + $0x2c0] ss:$16 sps:$4 sm:$0xff]   ;;  %v2105_v13 = vld [vmem:[#allocation2 + $0x88] ss:$16 sps:$4 sm:$0xff]  }
  0x34   :  { %876 = vmatpush1.bf16.msra.mxu1 %v2011_v14  ;;  %v2033_v27 = vld [vmem:[#allocation2 + $0xe4] ss:$16 sps:$4 sm:$0xff]   ;;  %v2035_v30 = vld [vmem:[#allocation2 + $0xe0] ss:$16 sps:$4 sm:$0xff]   ;;  %v2110_v14 = vld [vmem:[#allocation2 + $0xac] ss:$16 sps:$4 sm:$0xff]  }
  0x35   :  { %877 = vmatprep.subr.bf16.mxu1 %v2015_v15  ;;  %919 = vmatpush1.bf16.msra.mxu0 %v2014_v16  ;;  %v2036_v29 = vld [vmem:[#allocation2 + $0x2e4] ss:$16 sps:$4 sm:$0xff]   ;;  %v2038_v32 = vld [vmem:[#allocation2 + $0x2e0] ss:$16 sps:$4 sm:$0xff]   ;;  %v2108_v15 = vld [vmem:[#allocation2 + $0xa8] ss:$16 sps:$4 sm:$0xff]  }
  0x36   :  { %920 = vmatprep.subr.bf16.mxu0 %v2018_v17  ;;  %v2039_v31 = vld [vmem:[#allocation2 + $0x104] ss:$16 sps:$4 sm:$0xff]   ;;  %v2041_v34 = vld [vmem:[#allocation2 + $0x100] ss:$16 sps:$4 sm:$0xff]   ;;  %v2113_v16 = vld [vmem:[#allocation2 + $0xcc] ss:$16 sps:$4 sm:$0xff]  }
  0x37   :  { %v2042_v33 = vld [vmem:[#allocation2 + $0x304] ss:$16 sps:$4 sm:$0xff]   ;;  %v2044_v36 = vld [vmem:[#allocation2 + $0x300] ss:$16 sps:$4 sm:$0xff]   ;;  %v2111_v17 = vld [vmem:[#allocation2 + $0xc8] ss:$16 sps:$4 sm:$0xff]  }
  0x38   :  { %878 = vmatpush1.bf16.msra.mxu1 %v2017_v18  ;;  %v2045_v35 = vld [vmem:[#allocation2 + $0x124] ss:$16 sps:$4 sm:$0xff]   ;;  %v2047_v38 = vld [vmem:[#allocation2 + $0x120] ss:$16 sps:$4 sm:$0xff]   ;;  %v2116_v18 = vld [vmem:[#allocation2 + $0xec] ss:$16 sps:$4 sm:$0xff]  }
  0x39   :  { %879 = vmatprep.subr.bf16.mxu1 %v2021_v19  ;;  %921 = vmatpush1.bf16.msra.mxu0 %v2020_v20  ;;  %v2048_v37 = vld [vmem:[#allocation2 + $0x324] ss:$16 sps:$4 sm:$0xff]   ;;  %v2050_v40 = vld [vmem:[#allocation2 + $0x320] ss:$16 sps:$4 sm:$0xff]  }
  0x3a   :  { %922 = vmatprep.subr.bf16.mxu0 %v2024_v21  ;;  %v2051_v39 = vld [vmem:[#allocation2 + $0x144] ss:$16 sps:$4 sm:$0xff]   ;;  %v2053_v42 = vld [vmem:[#allocation2 + $0x140] ss:$16 sps:$4 sm:$0xff]  }
  0x3b   :  { %v2054_v41 = vld [vmem:[#allocation2 + $0x344] ss:$16 sps:$4 sm:$0xff]   ;;  %v2056_v44 = vld [vmem:[#allocation2 + $0x340] ss:$16 sps:$4 sm:$0xff]  }
  0x3c   :  { %880 = vmatpush1.bf16.msra.mxu1 %v2023_v22  ;;  %v2057_v43 = vld [vmem:[#allocation2 + $0x164] ss:$16 sps:$4 sm:$0xff]   ;;  %v2059_v46 = vld [vmem:[#allocation2 + $0x160] ss:$16 sps:$4 sm:$0xff]   ;;  %v2114_v22 = vld [vmem:[#allocation2 + $0xe8] ss:$16 sps:$4 sm:$0xff]  }
  0x3d   :  { %881 = vmatprep.subr.bf16.mxu1 %v2027_v23  ;;  %923 = vmatpush1.bf16.msra.mxu0 %v2026_v24  ;;  %v2060_v45 = vld [vmem:[#allocation2 + $0x364] ss:$16 sps:$4 sm:$0xff]   ;;  %v2062_v49 = vld [vmem:[#allocation2 + $0x360] ss:$16 sps:$4 sm:$0xff]   ;;  %v2119_v23 = vld [vmem:[#allocation2 + $0x10c] ss:$16 sps:$4 sm:$0xff]  }
  0x3e   :  { %924 = vmatprep.subr.bf16.mxu0 %v2030_v25  ;;  %v2088_v47 = vld [vmem:[%s2526_s0 + $0x4] ss:$16 sps:$4 sm:$0xff]   ;;  %v2065_v52 = vld [vmem:[#allocation2 + $0x180] ss:$16 sps:$4 sm:$0xff]  }
  0x3f   :  { %v2063_v48 = vld [vmem:[#allocation2 + $0x184] ss:$16 sps:$4 sm:$0xff]   ;;  %901 = vmatprep.mubr.bf16.mxu1 %v2088_v47  ;;  %v2068_v54 = vld [vmem:[#allocation2 + $0x380] ss:$16 sps:$4 sm:$0xff]  }
  0x40   :  { %882 = vmatpush1.bf16.msra.mxu1 %v2029_v26  ;;  %v2066_v50 = vld [vmem:[#allocation2 + $0x384] ss:$16 sps:$4 sm:$0xff]   ;;  %v2071_v56 = vld [vmem:[#allocation2 + $0x1a0] ss:$16 sps:$4 sm:$0xff]   ;;  %v2117_v26 = vld [vmem:[#allocation2 + $0x108] ss:$16 sps:$4 sm:$0xff]  }
  0x41   :  { %883 = vmatprep.subr.bf16.mxu1 %v2033_v27  ;;  %925 = vmatpush1.bf16.msra.mxu0 %v2032_v28  ;;  %v2069_v53 = vld [vmem:[#allocation2 + $0x1a4] ss:$16 sps:$4 sm:$0xff]   ;;  %v2074_v58 = vld [vmem:[#allocation2 + $0x3a0] ss:$16 sps:$4 sm:$0xff]   ;;  %v2122_v27 = vld [vmem:[#allocation2 + $0x12c] ss:$16 sps:$4 sm:$0xff]  }
  0x42   :  { %926 = vmatprep.subr.bf16.mxu0 %v2036_v29  ;;  %v2072_v55 = vld [vmem:[#allocation2 + $0x3a4] ss:$16 sps:$4 sm:$0xff]   ;;  %v2077_v60 = vld [vmem:[#allocation2 + $0x1c0] ss:$16 sps:$4 sm:$0xff]  }
  0x43   :  { %v2075_v57 = vld [vmem:[#allocation2 + $0x1c4] ss:$16 sps:$4 sm:$0xff]   ;;  %v2080_v62 = vld [vmem:[#allocation2 + $0x3c0] ss:$16 sps:$4 sm:$0xff]  }
  0x44   :  { %884 = vmatpush1.bf16.msra.mxu1 %v2035_v30  ;;  %v2078_v59 = vld [vmem:[#allocation2 + $0x3c4] ss:$16 sps:$4 sm:$0xff]   ;;  %v2083_v0 = vld [vmem:[#allocation2 + $0x1e0] ss:$16 sps:$4 sm:$0xff]   ;;  %v2120_v30 = vld [vmem:[#allocation2 + $0x128] ss:$16 sps:$4 sm:$0xff]  }
  0x45   :  { %885 = vmatprep.subr.bf16.mxu1 %v2039_v31  ;;  %927 = vmatpush1.bf16.msra.mxu0 %v2038_v32  ;;  %v2081_v61 = vld [vmem:[#allocation2 + $0x1e4] ss:$16 sps:$4 sm:$0xff]   ;;  %v2089_v2 = vld [vmem:[#allocation2 + $0x3e0] ss:$16 sps:$4 sm:$0xff]   ;;  %v2125_v31 = vld [vmem:[#allocation2 + $0x14c] ss:$16 sps:$4 sm:$0xff]  }
  0x46   :  { %928 = vmatprep.subr.bf16.mxu0 %v2042_v33  ;;  %v2084_v63 = vld [vmem:[#allocation2 + $0x3e4] ss:$16 sps:$4 sm:$0xff]   ;;  %v2431_v3 = vld [vmem:[%s2526_s0] ss:$16 sps:$4 sm:$0xff]  }
  0x47   :  { %v2189_v19 = vld [vmem:[#allocation4] ss:$8 sps:$4 sm:$0xff]   ;;  %v2191_v20 = vld [vmem:[#allocation4 + $0x4] ss:$8 sps:$4 sm:$0xff]   ;;  %v2194_v21 = vld [vmem:[#allocation4 + $0x14] ss:$8 sps:$4 sm:$0xff]  }
  0x48   :  { %886 = vmatpush1.bf16.msra.mxu1 %v2041_v34  ;;  %v2192_v24 = vld [vmem:[#allocation4 + $0x10] ss:$8 sps:$4 sm:$0xff]   ;;  %v2197_v25 = vld [vmem:[#allocation4 + $0x24] ss:$8 sps:$4 sm:$0xff]   ;;  %v2195_v28 = vld [vmem:[#allocation4 + $0x20] ss:$8 sps:$4 sm:$0xff]  }
  0x49   :  { %887 = vmatprep.subr.bf16.mxu1 %v2045_v35  ;;  %929 = vmatpush1.bf16.msra.mxu0 %v2044_v36  ;;  %v2200_v29 = vld [vmem:[#allocation4 + $0x34] ss:$8 sps:$4 sm:$0xff]   ;;  %v2198_v32 = vld [vmem:[#allocation4 + $0x30] ss:$8 sps:$4 sm:$0xff]   ;;  %v2203_v33 = vld [vmem:[#allocation4 + $0x44] ss:$8 sps:$4 sm:$0xff]  }
  0x4a   :  { %930 = vmatprep.subr.bf16.mxu0 %v2048_v37  ;;  %v2123_v34 = vld [vmem:[#allocation2 + $0x148] ss:$16 sps:$4 sm:$0xff]   ;;  %v2128_v35 = vld [vmem:[#allocation2 + $0x16c] ss:$16 sps:$4 sm:$0xff]  }
  0x4b   :  { %v2201_v36 = vld [vmem:[#allocation4 + $0x40] ss:$8 sps:$4 sm:$0xff]  }
  0x4c   :  { %888 = vmatpush1.bf16.msra.mxu1 %v2047_v38  ;;  %v2126_v37 = vld [vmem:[#allocation2 + $0x168] ss:$16 sps:$4 sm:$0xff]   ;;  %v2206_v38 = vld [vmem:[#allocation4 + $0x54] ss:$8 sps:$4 sm:$0xff]  }
  0x4d   :  { %889 = vmatprep.subr.bf16.mxu1 %v2051_v39  ;;  %931 = vmatpush1.bf16.msra.mxu0 %v2050_v40  ;;  %v2131_v39 = vld [vmem:[#allocation2 + $0x18c] ss:$16 sps:$4 sm:$0xff]   ;;  %v2204_v40 = vld [vmem:[#allocation4 + $0x50] ss:$8 sps:$4 sm:$0xff]  }
  0x4e   :  { %932 = vmatprep.subr.bf16.mxu0 %v2054_v41  ;;  %v2209_v41 = vld [vmem:[#allocation4 + $0x64] ss:$8 sps:$4 sm:$0xff]  }
  0x50   :  { %890 = vmatpush1.bf16.msra.mxu1 %v2053_v42  ;;  %v2129_v42 = vld [vmem:[#allocation2 + $0x188] ss:$16 sps:$4 sm:$0xff]  }
  0x51   :  { %891 = vmatprep.subr.bf16.mxu1 %v2057_v43  ;;  %933 = vmatpush1.bf16.msra.mxu0 %v2056_v44  ;;  %v2134_v43 = vld [vmem:[#allocation2 + $0x1ac] ss:$16 sps:$4 sm:$0xff]   ;;  %v2207_v44 = vld [vmem:[#allocation4 + $0x60] ss:$8 sps:$4 sm:$0xff]  }
  0x52   :  { %934 = vmatprep.subr.bf16.mxu0 %v2060_v45  ;;  %v2212_v45 = vld [vmem:[#allocation4 + $0x74] ss:$8 sps:$4 sm:$0xff]  }
  0x54   :  { %892 = vmatpush1.bf16.msra.mxu1 %v2059_v46  ;;  %v2132_v46 = vld [vmem:[#allocation2 + $0x1a8] ss:$16 sps:$4 sm:$0xff]  }
  0x55   :  { %893 = vmatprep.subr.bf16.mxu1 %v2063_v48  ;;  %935 = vmatpush1.bf16.msra.mxu0 %v2062_v49  ;;  %v2210_v48 = vld [vmem:[#allocation4 + $0x70] ss:$8 sps:$4 sm:$0xff]   ;;  %v2215_v49 = vld [vmem:[#allocation4 + $0x84] ss:$8 sps:$4 sm:$0xff]  }
  0x56   :  { %936 = vmatprep.subr.bf16.mxu0 %v2066_v50  ;;  %v2135_v50 = vld [vmem:[#allocation2 + $0x1c8] ss:$16 sps:$4 sm:$0xff]  }
  0x58   :  { %894 = vmatpush1.bf16.msra.mxu1 %v2065_v52  ;;  %v2140_v52 = vld [vmem:[#allocation2 + $0x1ec] ss:$16 sps:$4 sm:$0xff]  }
  0x59   :  { %895 = vmatprep.subr.bf16.mxu1 %v2069_v53  ;;  %937 = vmatpush1.bf16.msra.mxu0 %v2068_v54  ;;  %v2213_v53 = vld [vmem:[#allocation4 + $0x80] ss:$8 sps:$4 sm:$0xff]   ;;  %v2218_v54 = vld [vmem:[#allocation4 + $0x94] ss:$8 sps:$4 sm:$0xff]  }
  0x5a   :  { %938 = vmatprep.subr.bf16.mxu0 %v2072_v55  ;;  %v2138_v55 = vld [vmem:[#allocation2 + $0x1e8] ss:$16 sps:$4 sm:$0xff]  }
  0x5c   :  { %896 = vmatpush1.bf16.msra.mxu1 %v2071_v56  ;;  %v2143_v56 = vld [vmem:[#allocation2 + $0x20c] ss:$16 sps:$4 sm:$0xff]  }
  0x5d   :  { %897 = vmatprep.subr.bf16.mxu1 %v2075_v57  ;;  %939 = vmatpush1.bf16.msra.mxu0 %v2074_v58  ;;  %v2216_v57 = vld [vmem:[#allocation4 + $0x90] ss:$8 sps:$4 sm:$0xff]   ;;  %v2221_v58 = vld [vmem:[#allocation4 + $0xa4] ss:$8 sps:$4 sm:$0xff]  }
  0x5e   :  { %940 = vmatprep.subr.bf16.mxu0 %v2078_v59  ;;  %v2141_v59 = vld [vmem:[#allocation2 + $0x208] ss:$16 sps:$4 sm:$0xff]  }
  0x60   :  { %898 = vmatpush1.bf16.msra.mxu1 %v2077_v60  ;;  %v2146_v60 = vld [vmem:[#allocation2 + $0x22c] ss:$16 sps:$4 sm:$0xff]  }
  0x61   :  { %899 = vmatprep.subr.bf16.mxu1 %v2081_v61  ;;  %941 = vmatpush1.bf16.msra.mxu0 %v2080_v62  ;;  %v2219_v61 = vld [vmem:[#allocation4 + $0xa0] ss:$8 sps:$4 sm:$0xff]   ;;  %v2224_v62 = vld [vmem:[#allocation4 + $0xb4] ss:$8 sps:$4 sm:$0xff]  }
  0x62   :  { %942 = vmatprep.subr.bf16.mxu0 %v2084_v63  ;;  %v2144_v63 = vld [vmem:[#allocation2 + $0x228] ss:$16 sps:$4 sm:$0xff]  }
  0x64   :  { %900 = vmatpush1.bf16.msra.mxu1 %v2083_v0  ;;  %v2149_v0 = vld [vmem:[#allocation2 + $0x24c] ss:$16 sps:$4 sm:$0xff]  }
  0x65   :  { %955 = vmatprep.subr.bf16.mxu1 %v2092_v1  ;;  %943 = vmatpush1.bf16.msra.mxu0 %v2089_v2  ;;  %v2222_v1 = vld [vmem:[#allocation4 + $0xb0] ss:$8 sps:$4 sm:$0xff]   ;;  %v2227_v2 = vld [vmem:[#allocation4 + $0xc4] ss:$8 sps:$4 sm:$0xff]  }
  0x66   :  { %1449 = vmatprep.subr.bf16.mxu0 %v2191_v20  ;;  %v2236_v20 = vld [vmem:[#allocation4 + $0xf4] ss:$8 sps:$4 sm:$0xff]  }
  0x67   :  { %902 = vmatmul.mubr.bf16.vlgmr.msra.gmra.mrb[0].mxu1 %v2431_v3 }
  0x68   :  { %956 = vmatpush1.bf16.msra.mxu1 %v2090_v4  ;;  %987 = vmatprep.mubr.bf16.mxu1 %v2088_v47  ;;  %v2137_v47 = vld [vmem:[#allocation2 + $0x1cc] ss:$16 sps:$4 sm:$0xff]   ;;  %v2147_v4 = vld [vmem:[#allocation2 + $0x248] ss:$16 sps:$4 sm:$0xff]  }
  0x69   :  { %945 = vmatmul.mubr.bf16.vlgmr.msra.gmra.mrb[0].mxu0 %v2436_v5  ;;  %957 = vmatprep.subr.bf16.mxu1 %v2098_v6  ;;  %v2152_v6 = vld [vmem:[#allocation2 + $0x26c] ss:$16 sps:$4 sm:$0xff]  }
  0x6a   :  { %1450 = vmatpush1.bf16.msra.mxu0 %v2189_v19  ;;  %v2167_v19 = vld [vmem:[#allocation2 + $0x30c] ss:$16 sps:$4 sm:$0xff]  }
  0x6b   :  { %1451 = vmatprep.subr.bf16.mxu0 %v2194_v21  ;;  %v2234_v21 = vld [vmem:[#allocation4 + $0xf0] ss:$8 sps:$4 sm:$0xff]  }
  0x6c   :  { %958 = vmatpush1.bf16.msra.mxu1 %v2096_v7  ;;  %v2225_v7 = vld [vmem:[#allocation4 + $0xc0] ss:$8 sps:$4 sm:$0xff]  }
  0x6d   :  { %959 = vmatprep.subr.bf16.mxu1 %v2101_v8  ;;  %v2150_v8 = vld [vmem:[#allocation2 + $0x268] ss:$16 sps:$4 sm:$0xff]  }
  0x6e   :  { %1452 = vmatpush1.bf16.msra.mxu0 %v2192_v24  ;;  %v2239_v24 = vld [vmem:[#allocation4 + $0x104] ss:$8 sps:$4 sm:$0xff]  }
  0x6f   :  { %1453 = vmatprep.subr.bf16.mxu0 %v2197_v25  ;;  %v2168_v25 = vld [vmem:[#allocation2 + $0x328] ss:$16 sps:$4 sm:$0xff]  }
  0x70   :  { %960 = vmatpush1.bf16.msra.mxu1 %v2099_v9  ;;  %v2158_v9 = vld [vmem:[#allocation2 + $0x2ac] ss:$16 sps:$4 sm:$0xff]  }
  0x71   :  { %961 = vmatprep.subr.bf16.mxu1 %v2104_v10  ;;  %v2156_v10 = vld [vmem:[#allocation2 + $0x2a8] ss:$16 sps:$4 sm:$0xff]  }
  0x72   :  { %1454 = vmatpush1.bf16.msra.mxu0 %v2195_v28  ;;  %v2176_v28 = vld [vmem:[#allocation2 + $0x36c] ss:$16 sps:$4 sm:$0xff]  }
  0x73   :  { %1455 = vmatprep.subr.bf16.mxu0 %v2200_v29  ;;  %v2174_v29 = vld [vmem:[#allocation2 + $0x368] ss:$16 sps:$4 sm:$0xff]  }
  0x74   :  { %962 = vmatpush1.bf16.msra.mxu1 %v2102_v11  ;;  %v2161_v11 = vld [vmem:[#allocation2 + $0x2cc] ss:$16 sps:$4 sm:$0xff]  }
  0x75   :  { %963 = vmatprep.subr.bf16.mxu1 %v2107_v12  ;;  %v2230_v12 = vld [vmem:[#allocation4 + $0xd4] ss:$8 sps:$4 sm:$0xff]  }
  0x76   :  { %1456 = vmatpush1.bf16.msra.mxu0 %v2198_v32  ;;  %v2182_v32 = vld [vmem:[#allocation2 + $0x3ac] ss:$16 sps:$4 sm:$0xff]  }
  0x77   :  { %1457 = vmatprep.subr.bf16.mxu0 %v2203_v33  ;;  %v2180_v33 = vld [vmem:[#allocation2 + $0x3a8] ss:$16 sps:$4 sm:$0xff]  }
  0x78   :  { %964 = vmatpush1.bf16.msra.mxu1 %v2105_v13  ;;  %v2228_v13 = vld [vmem:[#allocation4 + $0xd0] ss:$8 sps:$4 sm:$0xff]  }
  0x79   :  { %965 = vmatprep.subr.bf16.mxu1 %v2110_v14  ;;  %v2159_v14 = vld [vmem:[#allocation2 + $0x2c8] ss:$16 sps:$4 sm:$0xff]  }
  0x7a   :  { %1458 = vmatpush1.bf16.msra.mxu0 %v2201_v36  ;;  %v2188_v36 = vld [vmem:[#allocation2 + $0x3ec] ss:$16 sps:$4 sm:$0xff]  }
  0x7b   :  { %1459 = vmatprep.subr.bf16.mxu0 %v2206_v38  ;;  %v189_v38 = vlaneseq }
  0x7c   :  { %966 = vmatpush1.bf16.msra.mxu1 %v2108_v15  ;;  %v2164_v15 = vld [vmem:[#allocation2 + $0x2ec] ss:$16 sps:$4 sm:$0xff]  }
  0x7d   :  { %967 = vmatprep.subr.bf16.mxu1 %v2113_v16  ;;  %v2233_v16 = vld [vmem:[#allocation4 + $0xe4] ss:$8 sps:$4 sm:$0xff]  }
  0x7e   :  { %1460 = vmatpush1.bf16.msra.mxu0 %v2204_v40 }
  0x7f   :  { %1461 = vmatprep.subr.bf16.mxu0 %v2209_v41  ;;  %v2449_v41 = vld [vmem:[%s2528_s2] sm:$0xf] }
  0x80   :  { %968 = vmatpush1.bf16.msra.mxu1 %v2111_v17  ;;  %v2231_v17 = vld [vmem:[#allocation4 + $0xe0] ss:$8 sps:$4 sm:$0xff]  }
  0x81   :  { %969 = vmatprep.subr.bf16.mxu1 %v2116_v18  ;;  %v2162_v18 = vld [vmem:[#allocation2 + $0x2e8] ss:$16 sps:$4 sm:$0xff]  }
  0x82   :  { %1462 = vmatpush1.bf16.msra.mxu0 %v2207_v44 }
  0x83   :  { %1463 = vmatprep.subr.bf16.mxu0 %v2212_v45 }
  0x84   :  { %970 = vmatpush1.bf16.msra.mxu1 %v2114_v22  ;;  %v2165_v22 = vld [vmem:[#allocation2 + $0x308] ss:$16 sps:$4 sm:$0xff]  }
  0x85   :  { %971 = vmatprep.subr.bf16.mxu1 %v2119_v23  ;;  %v2170_v23 = vld [vmem:[#allocation2 + $0x32c] ss:$16 sps:$4 sm:$0xff]  }
  0x86   :  { %1464 = vmatpush1.bf16.msra.mxu0 %v2210_v48 }
  0x87   :  { %1465 = vmatprep.subr.bf16.mxu0 %v2215_v49 }
  0x88   :  { %972 = vmatpush1.bf16.msra.mxu1 %v2117_v26  ;;  %v2173_v26 = vld [vmem:[#allocation2 + $0x34c] ss:$16 sps:$4 sm:$0xff]  }
  0x89   :  { %973 = vmatprep.subr.bf16.mxu1 %v2122_v27  ;;  %v2171_v27 = vld [vmem:[#allocation2 + $0x348] ss:$16 sps:$4 sm:$0xff]  }
  0x8a   :  { %1466 = vmatpush1.bf16.msra.mxu0 %v2213_v53 }
  0x8b   :  { %1467 = vmatprep.subr.bf16.mxu0 %v2218_v54 }
  0x8c   :  { %974 = vmatpush1.bf16.msra.mxu1 %v2120_v30  ;;  %v2179_v30 = vld [vmem:[#allocation2 + $0x38c] ss:$16 sps:$4 sm:$0xff]  }
  0x8d   :  { %975 = vmatprep.subr.bf16.mxu1 %v2125_v31  ;;  %v2177_v31 = vld [vmem:[#allocation2 + $0x388] ss:$16 sps:$4 sm:$0xff]  }
  0x8e   :  { %1468 = vmatpush1.bf16.msra.mxu0 %v2216_v57 }
  0x8f   :  { %1469 = vmatprep.subr.bf16.mxu0 %v2221_v58 }
  0x90   :  { %976 = vmatpush1.bf16.msra.mxu1 %v2123_v34  ;;  %v2185_v34 = vld [vmem:[#allocation2 + $0x3cc] ss:$16 sps:$4 sm:$0xff]  }
  0x91   :  { %977 = vmatprep.subr.bf16.mxu1 %v2128_v35  ;;  %v2183_v35 = vld [vmem:[#allocation2 + $0x3c8] ss:$16 sps:$4 sm:$0xff]  }
  0x92   :  { %1470 = vmatpush1.bf16.msra.mxu0 %v2219_v61 }
  0x93   :  { %1471 = vmatprep.subr.bf16.mxu0 %v2224_v62 }
  0x94   :  { %978 = vmatpush1.bf16.msra.mxu1 %v2126_v37  ;;  %v2186_v37 = vld [vmem:[#allocation2 + $0x3e8] ss:$16 sps:$4 sm:$0xff]  }
  0x95   :  { %979 = vmatprep.subr.bf16.mxu1 %v2131_v39  ;;  %v2443_v39 = vshrl.u32 %v189_v38, 7  ;;  %v2273_v38 = vld [vmem:[#allocation4 + $0x1c0] ss:$8 sps:$4 sm:$0xff]  }
  0x96   :  { %1472 = vmatpush1.bf16.msra.mxu0 %v2222_v1 }
  0x97   :  { %1473 = vmatprep.subr.bf16.mxu0 %v2227_v2  ;;  %v191_v40 = vsub.s32 0, %v2443_v39 }
  0x98   :  { %980 = vmatpush1.bf16.msra.mxu1 %v2129_v42  ;;  %v195_v42 = vsub.s32 1, %v2443_v39 }
  0x99   :  { %981 = vmatprep.subr.bf16.mxu1 %v2134_v43  ;;  %v192_v43 = vrot.slane %v2449_v41, %v191_v40 }
  0x9a   :  { %1474 = vmatpush1.bf16.msra.mxu0 %v2225_v7  ;;  %v2285_v7 = vld [vmem:[%s2531_s5 + $0x40] sm:$0xff]  }
  0x9b   :  { %1475 = vmatprep.subr.bf16.mxu0 %v2230_v12  ;;  %v2243_v12 = vld [vmem:[#allocation4 + $0x120] ss:$8 sps:$4 sm:$0xff]  }
  0x9c   :  { %982 = vmatpush1.bf16.msra.mxu1 %v2132_v46 }
  0x9d   :  { %983 = vmatprep.subr.bf16.mxu1 %v2137_v47 }
  0x9e   :  { %1476 = vmatpush1.bf16.msra.mxu0 %v2228_v13  ;;  %v2290_v13 = vld [vmem:[%s2531_s5 + $0x10] sm:$0xff]  }
  0x9f   :  { %1477 = vmatprep.subr.bf16.mxu0 %v2233_v16  ;;  %v2246_v16 = vld [vmem:[#allocation4 + $0x130] ss:$8 sps:$4 sm:$0xff]  }
  0xa0   :  { %984 = vmatpush1.bf16.msra.mxu1 %v2135_v50 }
  0xa1   :  { %985 = vmatprep.subr.bf16.mxu1 %v2140_v52 }
  0xa2   :  { %1478 = vmatpush1.bf16.msra.mxu0 %v2231_v17  ;;  %v2292_v17 = vld [vmem:[%s2531_s5 + $0x18] sm:$0xff]  }
  0xa3   :  { %1479 = vmatprep.subr.bf16.mxu0 %v2236_v20  ;;  %v2249_v20 = vld [vmem:[#allocation4 + $0x140] ss:$8 sps:$4 sm:$0xff]  }
  0xa4   :  { %986 = vmatpush1.bf16.msra.mxu1 %v2138_v55 }
  0xa5   :  { %998 = vmatprep.subr.bf16.mxu1 %v2143_v56 }
  0xa6   :  { %1480 = vmatpush1.bf16.msra.mxu0 %v2234_v21  ;;  %v2294_v21 = vld [vmem:[%s2531_s5 + $0x20] sm:$0xff]  }
  0xa7   :  { %988 = vmatmul.mubr.bf16.vlgmr.msra.gmra.mrb[4].mxu1 %v2431_v3  ;;  %v2155_v3 = vld [vmem:[#allocation2 + $0x28c] ss:$16 sps:$4 sm:$0xff]   ;;  %1492 = vmatprep.subr.bf16.mxu0 %v2239_v24  ;;  %v2252_v24 = vld [vmem:[#allocation4 + $0x150] ss:$8 sps:$4 sm:$0xff]  }
  0xa8   :  { %999 = vmatpush1.bf16.msra.mxu1 %v2141_v59  ;;  %1030 = vmatprep.mubr.bf16.mxu1 %v2425_v51  ;;  %v2153_v51 = vld [vmem:[#allocation2 + $0x288] ss:$16 sps:$4 sm:$0xff]  }
  0xa9   :  { %1000 = vmatprep.subr.bf16.mxu1 %v2146_v60 }
  0xac   :  { %1001 = vmatpush1.bf16.msra.mxu1 %v2144_v63 }
  0xad   :  { %1002 = vmatprep.subr.bf16.mxu1 %v2149_v0 }
  0xb0   :  { %1003 = vmatpush1.bf16.msra.mxu1 %v2147_v4  ;;  %v2237_v4 = vld [vmem:[#allocation4 + $0x100] ss:$8 sps:$4 sm:$0xff]  }
  0xb1   :  { %1004 = vmatprep.subr.bf16.mxu1 %v2152_v6  ;;  %v2242_v6 = vld [vmem:[#allocation4 + $0x114] ss:$8 sps:$4 sm:$0xff]  }
  0xb4   :  { %1005 = vmatpush1.bf16.msra.mxu1 %v2150_v8  ;;  %v2286_v8 = vld [vmem:[%s2531_s5] sm:$0xff]  }
  0xb5   :  { %1006 = vmatprep.subr.bf16.mxu1 %v2155_v3  ;;  %v2287_v3 = vld [vmem:[%s2531_s5 + $0x48] sm:$0xff]  }
  0xb8   :  { %1007 = vmatpush1.bf16.msra.mxu1 %v2153_v51  ;;  %v2240_v51 = vld [vmem:[#allocation4 + $0x110] ss:$8 sps:$4 sm:$0xff]  }
  0xb9   :  { %1008 = vmatprep.subr.bf16.mxu1 %v2158_v9  ;;  %v2288_v9 = vld [vmem:[%s2531_s5 + $0x8] sm:$0xff]  }
  0xbc   :  { %1009 = vmatpush1.bf16.msra.mxu1 %v2156_v10  ;;  %v2245_v10 = vld [vmem:[#allocation4 + $0x124] ss:$8 sps:$4 sm:$0xff]  }
  0xbd   :  { %1010 = vmatprep.subr.bf16.mxu1 %v2161_v11  ;;  %v2289_v11 = vld [vmem:[%s2531_s5 + $0x50] sm:$0xff]  }
  0xc0   :  { %1011 = vmatpush1.bf16.msra.mxu1 %v2159_v14  ;;  %v2248_v14 = vld [vmem:[#allocation4 + $0x134] ss:$8 sps:$4 sm:$0xff]  }
  0xc1   :  { %1012 = vmatprep.subr.bf16.mxu1 %v2164_v15  ;;  %v2291_v15 = vld [vmem:[%s2531_s5 + $0x58] sm:$0xff]  }
  0xc4   :  { %1013 = vmatpush1.bf16.msra.mxu1 %v2162_v18  ;;  %v2251_v18 = vld [vmem:[#allocation4 + $0x144] ss:$8 sps:$4 sm:$0xff]  }
  0xc5   :  { %1014 = vmatprep.subr.bf16.mxu1 %v2167_v19  ;;  %v2293_v19 = vld [vmem:[%s2531_s5 + $0x60] sm:$0xff]  }
  0xc8   :  { %1015 = vmatpush1.bf16.msra.mxu1 %v2165_v22  ;;  %v2254_v22 = vld [vmem:[#allocation4 + $0x154] ss:$8 sps:$4 sm:$0xff]  }
  0xc9   :  { %1016 = vmatprep.subr.bf16.mxu1 %v2170_v23  ;;  %v2295_v23 = vld [vmem:[%s2531_s5 + $0x68] sm:$0xff]  }
  0xcc   :  { %1017 = vmatpush1.bf16.msra.mxu1 %v2168_v25  ;;  %v2257_v25 = vld [vmem:[#allocation4 + $0x164] ss:$8 sps:$4 sm:$0xff]  }
  0xcd   :  { %1018 = vmatprep.subr.bf16.mxu1 %v2173_v26  ;;  %v2255_v26 = vld [vmem:[#allocation4 + $0x160] ss:$8 sps:$4 sm:$0xff]  }
  0xd0   :  { %1019 = vmatpush1.bf16.msra.mxu1 %v2171_v27  ;;  %v2260_v27 = vld [vmem:[#allocation4 + $0x174] ss:$8 sps:$4 sm:$0xff]  }
  0xd1   :  { %1020 = vmatprep.subr.bf16.mxu1 %v2176_v28  ;;  %v2258_v28 = vld [vmem:[#allocation4 + $0x170] ss:$8 sps:$4 sm:$0xff]  }
  0xd4   :  { %1021 = vmatpush1.bf16.msra.mxu1 %v2174_v29  ;;  %v2263_v29 = vld [vmem:[#allocation4 + $0x184] ss:$8 sps:$4 sm:$0xff]  }
  0xd5   :  { %1022 = vmatprep.subr.bf16.mxu1 %v2179_v30  ;;  %v2261_v30 = vld [vmem:[#allocation4 + $0x180] ss:$8 sps:$4 sm:$0xff]  }
  0xd8   :  { %1023 = vmatpush1.bf16.msra.mxu1 %v2177_v31  ;;  %v2266_v31 = vld [vmem:[#allocation4 + $0x194] ss:$8 sps:$4 sm:$0xff]  }
  0xd9   :  { %1024 = vmatprep.subr.bf16.mxu1 %v2182_v32  ;;  %v2264_v32 = vld [vmem:[#allocation4 + $0x190] ss:$8 sps:$4 sm:$0xff]  }
  0xdc   :  { %1025 = vmatpush1.bf16.msra.mxu1 %v2180_v33  ;;  %v2269_v33 = vld [vmem:[#allocation4 + $0x1a4] ss:$8 sps:$4 sm:$0xff]  }
  0xdd   :  { %1026 = vmatprep.subr.bf16.mxu1 %v2185_v34  ;;  %v2267_v34 = vld [vmem:[#allocation4 + $0x1a0] ss:$8 sps:$4 sm:$0xff]  }
  0xe0   :  { %1027 = vmatpush1.bf16.msra.mxu1 %v2183_v35  ;;  %v2272_v35 = vld [vmem:[#allocation4 + $0x1b4] ss:$8 sps:$4 sm:$0xff]  }
  0xe1   :  { %1028 = vmatprep.subr.bf16.mxu1 %v2188_v36  ;;  %v2270_v36 = vld [vmem:[#allocation4 + $0x1b0] ss:$8 sps:$4 sm:$0xff]  }
  0xe4   :  { %1029 = vmatpush1.bf16.msra.mxu1 %v2186_v37  ;;  %v2275_v37 = vld [vmem:[#allocation4 + $0x1c4] ss:$8 sps:$4 sm:$0xff]  }
  0xe5   :  { %1939 = vmatprep.subr.bf16.mxu1 %v2285_v7  ;;  %v2299_v7 = vld [vmem:[%s2531_s5 + $0x78] sm:$0xff]  }
  0xe7   :  { %1031 = vmatmul.mubr.bf16.vlgmr.msra.gmra.mrb[4].mxu1 %v2436_v5  ;;  %v196_v5 = vrot.slane %v2449_v41, %v195_v42 }
  0xe8   :  { %1940 = vmatpush3.bf16.msra.mxu1 %v2286_v8  ;;  %v2300_v8 = vld [vmem:[%s2531_s5 + $0x38] sm:$0xff]  }
  0xe9   :  { %1941 = vmatprep.subr.bf16.mxu1 %v2287_v3  ;;  %v1117_v3 = vld [vmem:[%s2530_s4] sm:$0x3] }
  0xec   :  { %1942 = vmatpush3.bf16.msra.mxu1 %v2288_v9  ;;  %v1126_v9 = vrot.slane %v1117_v3, %v195_v42 }
  0xed   :  { %1943 = vmatprep.subr.bf16.mxu1 %v2289_v11 }
  0xf0   :  { %1944 = vmatpush3.bf16.msra.mxu1 %v2290_v13 }
  0xf1   :  { %1945 = vmatprep.subr.bf16.mxu1 %v2291_v15 }
  0xf4   :  { %1946 = vmatpush3.bf16.msra.mxu1 %v2292_v17 }
  0xf5   :  { %1947 = vmatprep.subr.bf16.mxu1 %v2293_v19 }
  0xf8   :  { %1948 = vmatpush3.bf16.msra.mxu1 %v2294_v21 }
  0xf9   :  { %1949 = vmatprep.subr.bf16.mxu1 %v2295_v23 }
 0x13a   :  { %v903_v44 = vpop.f32.mrb[0].mxu1 }
 0x13b   :  { %v904_v45 = vadd.f32 %v903_v44, %v192_v43  ;;  %v905_v46 = vpop.f32.mrb[1].mxu1  ;;  %v2281_v44 = vld [vmem:[#allocation4 + $0x1e4] ss:$8 sps:$4 sm:$0xff]  }
 0x13c   :  { %v906_v47 = vadd.f32 %v905_v46, %v196_v5  ;;  %v907_v48 = vpop.f32.mrb[2].mxu1  ;;  %v946_v49 = vpop.f32.mrb[0].mxu0  ;;  %v2284_v46 = vld [vmem:[#allocation4 + $0x1f4] ss:$8 sps:$4 sm:$0xff]  }
 0x13d   :  { %v908_v50 = vadd.f32 %v907_v48, %v192_v43  ;;  %v947_v52 = vadd.f32 %v946_v49, %v904_v45  ;;  %v909_v53 = vpop.f32.mrb[3].mxu1  ;;  %v948_v54 = vpop.f32.mrb[1].mxu0  ;;  %v2278_v43 = vld [vmem:[#allocation4 + $0x1d4] ss:$8 sps:$4 sm:$0xff]   ;;  %v2279_v45 = vld [vmem:[#allocation4 + $0x1e0] ss:$8 sps:$4 sm:$0xff]  }
 0x13e   :  { %v910_v55 = vadd.f32 %v909_v53, %v196_v5  ;;  %v949_v56 = vadd.f32 %v948_v54, %v906_v47  ;;  %v950_v57 = vpop.f32.mrb[2].mxu0  ;;  %v2276_v5 = vld [vmem:[#allocation4 + $0x1d0] ss:$8 sps:$4 sm:$0xff]   ;;  %v199_v48 = vsub.s32 2, %v2443_v39  ;;  %v203_v49 = vsub.s32 3, %v2443_v39 }
 0x13f   :  { %v1041_v58 = vmax.f32 %v947_v52, 0.0  ;;  %v951_v59 = vadd.f32 %v950_v57, %v908_v50  ;;  %v952_v60 = vpop.f32.mrb[3].mxu0  ;;  %v2282_v47 = vld [vmem:[#allocation4 + $0x1f0] ss:$8 sps:$4 sm:$0xff]   ;;  %v1922_v39 = vld [vmem:[%s2532_s6] ss:$0 sm:$0xff] }
 0x140   :  { %v953_v61 = vadd.f32 %v952_v60, %v910_v55  ;;  %v1042_v63 = vmax.f32 %v949_v56, 0.0  ;;  %v200_v50 = vrot.slane %v2449_v41, %v199_v48  ;;  %v204_v52 = vrot.slane %v2449_v41, %v203_v49  ;;  %v2296_v41 = vld [vmem:[%s2531_s5 + $0x28] sm:$0xff]  }
 0x141   :  { %v1045_v62 = vmax.f32 %v951_v59, 0.0  ;;  %1950 = vmatpush3.bf16.msra.mxu1 %v2296_v41 }
 0x142   :  { %v1046_v0 = vmax.f32 %v953_v61, 0.0 }
 0x143   :  { %v1049_v1 = vpack.c.bf16 %v1045_v62, %v1041_v58 }
 0x144   :  { %v1050_v2 = vpack.c.bf16 %v1046_v0, %v1042_v63 }
 0x146   :  { %1481 = vmatprep.mubr.bf16.mxu0 %v1050_v2 }
 0x147   :  { %1482 = vmatmul.mubr.bf16.vlgmr.msra.gmra.mrb[4].mxu0 %v1049_v1 }
 0x148   :  { %1493 = vmatpush1.bf16.msra.mxu0 %v2237_v4  ;;  %v2297_v4 = vld [vmem:[%s2531_s5 + $0x70] sm:$0xff]  }
 0x149   :  { %1494 = vmatprep.subr.bf16.mxu0 %v2242_v6  ;;  %v2298_v6 = vld [vmem:[%s2531_s5 + $0x30] sm:$0xff]   ;;  %1951 = vmatprep.subr.bf16.mxu1 %v2297_v4 }
 0x14a   :  { %1952 = vmatpush3.bf16.msra.mxu1 %v2298_v6 }
 0x14b   :  { %1953 = vmatprep.subr.bf16.mxu1 %v2299_v7 }
 0x14c   :  { %1495 = vmatpush1.bf16.msra.mxu0 %v2240_v51  ;;  %v1122_v51 = vrot.slane %v1117_v3, %v191_v40 }
 0x14d   :  { %1496 = vmatprep.subr.bf16.mxu0 %v2245_v10 }
 0x14e   :  { %1954 = vmatpush3.bf16.msra.mxu1 %v2300_v8 }
 0x150   :  { %1497 = vmatpush1.bf16.msra.mxu0 %v2243_v12 }
 0x151   :  { %1498 = vmatprep.subr.bf16.mxu0 %v2248_v14 }
 0x154   :  { %1499 = vmatpush1.bf16.msra.mxu0 %v2246_v16 }
 0x155   :  { %1500 = vmatprep.subr.bf16.mxu0 %v2251_v18 }
 0x158   :  { %1501 = vmatpush1.bf16.msra.mxu0 %v2249_v20 }
 0x159   :  { %1502 = vmatprep.subr.bf16.mxu0 %v2254_v22 }
 0x15c   :  { %1503 = vmatpush1.bf16.msra.mxu0 %v2252_v24 }
 0x15d   :  { %1504 = vmatprep.subr.bf16.mxu0 %v2257_v25 }
 0x160   :  { %1505 = vmatpush1.bf16.msra.mxu0 %v2255_v26 }
 0x161   :  { %1506 = vmatprep.subr.bf16.mxu0 %v2260_v27 }
 0x164   :  { %1507 = vmatpush1.bf16.msra.mxu0 %v2258_v28 }
 0x165   :  { %1508 = vmatprep.subr.bf16.mxu0 %v2263_v29 }
 0x168   :  { %1509 = vmatpush1.bf16.msra.mxu0 %v2261_v30 }
 0x169   :  { %1510 = vmatprep.subr.bf16.mxu0 %v2266_v31 }
 0x16c   :  { %1511 = vmatpush1.bf16.msra.mxu0 %v2264_v32 }
 0x16d   :  { %1512 = vmatprep.subr.bf16.mxu0 %v2269_v33 }
 0x170   :  { %1513 = vmatpush1.bf16.msra.mxu0 %v2267_v34 }
 0x171   :  { %1514 = vmatprep.subr.bf16.mxu0 %v2272_v35 }
 0x174   :  { %1515 = vmatpush1.bf16.msra.mxu0 %v2270_v36 }
 0x175   :  { %1516 = vmatprep.subr.bf16.mxu0 %v2275_v37 }
 0x178   :  { %1517 = vmatpush1.bf16.msra.mxu0 %v2273_v38 }
 0x179   :  { %1518 = vmatprep.subr.bf16.mxu0 %v2278_v43 }
 0x17c   :  { %1519 = vmatpush1.bf16.msra.mxu0 %v2276_v5 }
 0x17d   :  { %1520 = vmatprep.subr.bf16.mxu0 %v2281_v44 }
 0x180   :  { %1521 = vmatpush1.bf16.msra.mxu0 %v2279_v45 }
 0x181   :  { %1522 = vmatprep.subr.bf16.mxu0 %v2284_v46 }
 0x184   :  { %1523 = vmatpush1.bf16.msra.mxu0 %v2282_v47 }
 0x1ba   :  { %v1032_v53 = vpop.f32.mrb[4].mxu1 }
 0x1bb   :  { %v1969_v54 = vadd.f32 %v1032_v53, %v200_v50  ;;  %v1034_v55 = vpop.f32.mrb[5].mxu1 }
 0x1bc   :  { %v1970_v56 = vadd.f32 %v1034_v55, %v204_v52  ;;  %v1036_v57 = vpop.f32.mrb[6].mxu1 }
 0x1bd   :  { %v1971_v58 = vadd.f32 %v1036_v57, %v200_v50  ;;  %v1038_v59 = vpop.f32.mrb[7].mxu1  ;;  %v1043_v61 = vmax.f32 %v1969_v54, 0.0 }
 0x1be   :  { %v1972_v60 = vadd.f32 %v1038_v59, %v204_v52  ;;  %v1044_v63 = vmax.f32 %v1970_v56, 0.0 }
 0x1bf   :  { %v1047_v62 = vmax.f32 %v1971_v58, 0.0 }
 0x1c0   :  { %v1048_v0 = vmax.f32 %v1972_v60, 0.0 }
 0x1c1   :  { %v1051_v1 = vpack.c.bf16 %v1047_v62, %v1043_v61 }
 0x1c2   :  { %v1052_v2 = vpack.c.bf16 %v1048_v0, %v1044_v63 }
 0x1c4   :  { %1524 = vmatprep.mubr.bf16.mxu0 %v1052_v2 }
 0x1c5   :  { %1525 = vmatmul.mubr.bf16.vlgmr.msra.gmra.mrb[4].mxu0 %v1051_v1 }
 0x298   :  { %v1526_v10 = vpop.f32.mrb[4].mxu0 }
 0x299   :  { %v1973_v11 = vadd.f32 %v1526_v10, %v1122_v51  ;;  %v1528_v12 = vpop.f32.mrb[5].mxu0 }
 0x29a   :  { %v1974_v13 = vadd.f32 %v1528_v12, %v1126_v9  ;;  %v1530_v14 = vpop.f32.mrb[6].mxu0 }
 0x29b   :  { %v1975_v15 = vadd.f32 %v1530_v14, %v1122_v51  ;;  %v1532_v16 = vpop.f32.mrb[7].mxu0  ;;  %v1535_v18 = vmax.f32 %v1973_v11, 0.0 }
 0x29c   :  { %v1976_v17 = vadd.f32 %v1532_v16, %v1126_v9  ;;  %v1536_v20 = vmax.f32 %v1974_v13, 0.0 }
 0x29d   :  { %v1537_v19 = vmax.f32 %v1975_v15, 0.0 }
 0x29e   :  { %v1538_v21 = vmax.f32 %v1976_v17, 0.0 }
 0x29f   :  { %v1539_v22 = vpack.c.bf16 %v1537_v19, %v1535_v18 }
 0x2a0   :  { %v1540_v23 = vpack.c.bf16 %v1538_v21, %v1536_v20 }
 0x2a2   :  { %1708 = vmatprep.mubr.bf16.mxu1 %v1540_v23 }
 0x2a3   :  { %1709 = vmatmul.mubr.bf16.vlgmr.msra.gmra.mrb[8].mxu1 %v1539_v22 }
 0x376   :  { %v1955_v40 = vpop.f32.mrb[8].mxu1 }
 0x377   :  { %v1956_v42 = vpop.f32.mrb[9].mxu1 }
 0x378   :  { %v1957_v24 = vadd.f32 %v1956_v42, %v1955_v40  ;;  %v1958_v25 = vpop.f32.mrb[10].mxu1 }
 0x379   :  { %v1959_v26 = vpop.f32.mrb[11].mxu1 }
 0x37a   :  { %v1711_v27 = vadd.f32 %v1957_v24, %v1922_v39  ;;  %v1960_v28 = vadd.f32 %v1959_v26, %v1958_v25 }
 0x37c   :  { %1718 = vst.msk [vmem:[%s2533_s7] sm:$0xff] %vm1717_vm0, %v1711_v27  ;;  %v1714_v29 = vadd.f32 %v1960_v28, %v1922_v39 }
 0x37e   :  { %1719 = vst.msk [vmem:[%s2533_s7 + $0x8] sm:$0xff] %vm1717_vm0, %v1714_v29 }
 0x37f   :  { %1724 = vsyncpa [#allocation3], 1 }
 0x380   :  { %1725 = vsyncpa [#allocation5], 1 }

</bundles_post_ra>
